<compile_context>
chip_gen: v7x
topology: tpu7x:2x2x1
jax: 0.10.0
libtpu: 0.0.40
codegen_flags: <defaults>
</compile_context>

<pallas_src>
import functools

import jax
import jax.numpy as jnp
from jax import lax
from jax.experimental import pallas as pl
from jax.experimental.pallas import tpu as pltpu

_LANES = 128
_SUBLANES = 8


def _tpu_generation():
    try:
        kind = jax.devices()[0].device_kind.lower()
    except Exception:
        return "unknown"
    if "v5 lite" in kind or "v5lite" in kind or "v5e" in kind:
        return "v5e"
    if "v6" in kind:
        return "v6e"
    if "v7" in kind or "7x" in kind:
        return "v7x"
    return "unknown"


def _block_budget_bytes(gen):
    # Target HBM-side bytes of ONE pipelined buffer of ONE stream.
    if gen in ("v6e", "v7x"):
        return 6 << 20   # amortize ~0.35us/step against 1.4-3.2 TB/s HBM
    return 2 << 20       # v5e (16 MiB scoped default) / v4 / unknown


def _vmem_cap_bytes(gen):
    if gen == "v7x":
        return 48 << 20  # 64 MiB physical per TC
    if gen in ("v5e", "v6e"):
        return 96 << 20  # 128 MiB physical
    return 32 << 20


def _choose_tile_rows(rows, lanes, bytes_per_elem, budget_bytes):
    """Largest sublane-aligned row tile within the per-buffer budget (<= rows)."""
    if rows < _SUBLANES:
        return rows  # block dim equal to the full array dim is always legal
    padded_lanes = ((lanes + _LANES - 1) // _LANES) * _LANES  # VMEM pads lanes to 128
    tile = budget_bytes // (padded_lanes * bytes_per_elem)
    tile = max(_SUBLANES, (tile // _SUBLANES) * _SUBLANES)
    tile = min(tile, (rows // _SUBLANES) * _SUBLANES)
    return tile


def _mean_normalize_kernel(x_ref, o_ref, *, inv_d):
    # Block = [tile_rows, d]; each row is reduced over the lane (last) axis.
    # Row sum accumulates in f32; the broadcast-subtract stays in the input
    # dtype, avoiding a full-block f32 copy for bf16 inputs.
    x = x_ref[...]
    row_sum = jnp.sum(x.astype(jnp.float32), axis=-1, keepdims=True)
    mean = (row_sum * inv_d).astype(x.dtype)
    o_ref[...] = x - mean


def _mean_normalize_packed_kernel(x_ref, o_ref, *, d):
    # Lane-dense block = [tile_rows, 128]; each 128-lane row holds 128//d
    # original rows as aligned d-lane segments (d divides 128, so d is a power
    # of two).  Per-segment mean via a log2(d)-step recursive-doubling
    # butterfly: at step s, lane j adds its partner lane j^s (always inside the
    # same aligned segment), implemented as two circular rolls + a select.
    # Exact f32 reduction, runs on XLU/VPU slots, keeps the MXU idle.
    x = x_ref[...]
    acc = x.astype(jnp.float32)
    lane = lax.broadcasted_iota(jnp.int32, acc.shape, 1)
    s = 1
    while s < d:
        up = pltpu.roll(acc, shift=_LANES - s, axis=1)   # value from lane j+s
        down = pltpu.roll(acc, shift=s, axis=1)          # value from lane j-s
        acc = acc + jnp.where((lane & s) == 0, up, down)
        s *= 2
    mean = (acc * (1.0 / d)).astype(x.dtype)
    o_ref[...] = x - mean


@functools.partial(jax.jit, static_argnames=("no_forward",))
def mean_normalize(x, no_forward=False):
    """Pallas forward of MeanNormalize: y = x - x.mean(axis=-1, keepdims=True).

    `no_forward=True` makes the forward an identity (as in the PyTorch module).
    The module's `no_backward` flag only affects its custom backward pass and
    is irrelevant to the forward computation implemented here.
    """
    if no_forward:
        return x

    orig_shape = x.shape
    d = orig_shape[-1]
    rows = 1
    for s in orig_shape[:-1]:
        rows *= s
    if rows == 0 or d == 0:
        return x

    gen = _tpu_generation()
    budget = _block_budget_bytes(gen)
    vmem_cap = _vmem_cap_bytes(gen)
    itemsize = jnp.dtype(x.dtype).itemsize
    cost = pl.CostEstimate(flops=2 * rows * d, transcendentals=0,
                           bytes_accessed=2 * rows * d * itemsize)
    # Note: a single "parallel" grid axis lets the runtime shard steps across
    # v7x's two TensorCores; v5e/v6e have one TC so it is neutral there.

    # --- Lane-dense path for small reduction dims (d divides 128) -------------
    if d < _LANES and _LANES % d == 0:
        per_packed = _LANES // d                 # original rows per packed row
        rows_p = -(-rows // per_packed)
        pad = rows_p * per_packed - rows
        x2 = x.reshape(rows, d)
        if pad:
            # One cheap wrapper-side pad keeps every small-d shape lane-dense
            # (unmasked full-lane stores) instead of the 87.5%-wasted-lane
            # general path; padded rows are sliced off after the kernel.
            x2 = jnp.pad(x2, ((0, pad), (0, 0)))
        x2 = x2.reshape(rows_p, _LANES)

        # Charge >=4 B/elem: the butterfly accumulates in f32 in-kernel.
        tile_r = _choose_tile_rows(rows_p, _LANES, max(itemsize, 4), budget)
        block_bytes = tile_r * _LANES * itemsize
        work_bytes = tile_r * _LANES * 4
        vmem_limit = int(min(vmem_cap,
                             max(16 << 20, 4 * block_bytes + 2 * work_bytes + (8 << 20))))

        out2 = pl.pallas_call(
            functools.partial(_mean_normalize_packed_kernel, d=d),
            out_shape=jax.ShapeDtypeStruct((rows_p, _LANES), x.dtype),
            grid_spec=pltpu.PrefetchScalarGridSpec(
                num_scalar_prefetch=0,
                grid=(pl.cdiv(rows_p, tile_r),),
                in_specs=[pl.BlockSpec((tile_r, _LANES), lambda i: (i, 0))],
                out_specs=pl.BlockSpec((tile_r, _LANES), lambda i: (i, 0)),
            ),
            compiler_params=pltpu.CompilerParams(
                dimension_semantics=("parallel",),
                vmem_limit_bytes=vmem_limit),
            cost_estimate=cost,
        )(x2)
        out2 = out2.reshape(rows_p * per_packed, d)
        if pad:
            out2 = out2[:rows]
        return out2.reshape(orig_shape)

    # --- General path: one row per sublane, full reduction axis on lanes ------
    # TODO(synk): for extremely large d the minimal [8, d] block (x2 streams x2
    # buffers) can exceed VMEM even with the raised limit; a lane-tiled two-pass
    # variant (partial-sum accumulator + fused subtract pass) would be needed.
    x2 = x.reshape(rows, d)
    tile_r = _choose_tile_rows(rows, d, itemsize, budget)
    padded_lanes = (-(-d // _LANES)) * _LANES
    block_bytes = tile_r * padded_lanes * itemsize
    vmem_limit = int(min(vmem_cap, max(16 << 20, 4 * block_bytes + (8 << 20))))

    out2 = pl.pallas_call(
        functools.partial(_mean_normalize_kernel, inv_d=1.0 / d),
        out_shape=jax.ShapeDtypeStruct((rows, d), x.dtype),
        grid_spec=pltpu.PrefetchScalarGridSpec(
            num_scalar_prefetch=0,
            grid=(pl.cdiv(rows, tile_r),),
            in_specs=[pl.BlockSpec((tile_r, d), lambda i: (i, 0))],
            out_specs=pl.BlockSpec((tile_r, d), lambda i: (i, 0)),
        ),
        compiler_params=pltpu.CompilerParams(
            dimension_semantics=("parallel",),
            vmem_limit_bytes=vmem_limit),
        cost_estimate=cost,
    )(x2)
    return out2.reshape(orig_shape)


if __name__ == "__main__":
    key = jax.random.PRNGKey(0)

    # Small NCHW conv-style input consistent with the module's usage
    # (exercises the lane-dense packed path, W=16 < 128).
    x = jax.random.normal(key, (2, 4, 16, 16), dtype=jnp.float32)
    y = jax.block_until_ready(mean_normalize(x, no_forward=False))
    ref = x - jnp.mean(x, axis=-1, keepdims=True)
    assert y.shape == x.shape and y.dtype == x.dtype
    assert jnp.allclose(y, ref, atol=1e-5, rtol=1e-5)

    # Packed path with row padding (rows * d not a multiple of 128).
    x_p = jax.random.normal(jax.random.PRNGKey(2), (3, 5, 16), dtype=jnp.float32)
    y_p = jax.block_until_ready(mean_normalize(x_p))
    ref_p = x_p - jnp.mean(x_p, axis=-1, keepdims=True)
    assert y_p.shape == x_p.shape
    assert jnp.allclose(y_p, ref_p, atol=1e-5, rtol=1e-5)

    # bf16 input on the packed path (dtype-aware tiling, f32 butterfly reduce).
    x_h = jax.random.normal(jax.random.PRNGKey(3), (2, 4, 16, 16)).astype(jnp.bfloat16)
    y_h = jax.block_until_ready(mean_normalize(x_h))
    xf = x_h.astype(jnp.float32)
    ref_h = (xf - jnp.mean(xf, axis=-1, keepdims=True)).astype(jnp.bfloat16)
    assert y_h.dtype == jnp.bfloat16
    assert jnp.allclose(y_h.astype(jnp.float32), ref_h.astype(jnp.float32), atol=5e-2)

    # General path with d >= 128 and a ragged row count (exercises cdiv/masked grid).
    x_b = jax.random.normal(jax.random.PRNGKey(1), (3, 7, 160), dtype=jnp.float32)
    y_b = jax.block_until_ready(mean_normalize(x_b))
    ref_b = x_b - jnp.mean(x_b, axis=-1, keepdims=True)
    assert y_b.shape == x_b.shape and y_b.dtype == x_b.dtype
    assert jnp.allclose(y_b, ref_b, atol=1e-5, rtol=1e-5)

    # no_forward=True path is identity.
    y_id = jax.block_until_ready(mean_normalize(x, no_forward=True))
    assert jnp.array_equal(y_id, x)

    print("KERNEL_OK")
</pallas_src>

<mosaic_0001>
module attributes {stable_mosaic.version = 11 : i64} {
  func.func @_mean_normalize_packed_kernel(%arg0: i32, %arg1: memref<16x128xf32, #tpu.memory_space<vmem>>, %arg2: memref<16x128xf32, #tpu.memory_space<vmem>>) attributes {dimension_semantics = [#tpu.dimension_semantics<parallel>], iteration_bounds = array<i64: 1>, scalar_prefetch = 0 : i64, scratch_operands = 0 : i64, tpu.core_type = #tpu.core_type<tc>, window_params = [{transform_indices = @transform_0, window_bounds = array<i64: 16, 128>}, {transform_indices = @transform_1, window_bounds = array<i64: 16, 128>}]} {
    %c0 = arith.constant 0 : index
    %c0_0 = arith.constant 0 : index
    %0 = vector.load %arg1[%c0, %c0_0] : memref<16x128xf32, #tpu.memory_space<vmem>>, vector<16x128xf32>
    %1 = tpu.iota {dimensions = array<i32: 1>} : vector<16x128xi32>
    %c127_i32 = arith.constant 127 : i32
    %2 = tpu.dynamic_rotate %0 by %c127_i32 dim 1 : vector<16x128xf32>, i32 -> vector<16x128xf32>
    %c1_i32 = arith.constant 1 : i32
    %3 = tpu.dynamic_rotate %0 by %c1_i32 dim 1 : vector<16x128xf32>, i32 -> vector<16x128xf32>
    %c1_i32_1 = arith.constant 1 : i32
    %4 = vector.broadcast %c1_i32_1 : i32 to vector<16x128xi32>
    %5 = arith.andi %1, %4 : vector<16x128xi32>
    %c0_i32 = arith.constant 0 : i32
    %6 = vector.broadcast %c0_i32 : i32 to vector<16x128xi32>
    %7 = arith.cmpi eq, %5, %6 : vector<16x128xi32>
    %8 = arith.select %7, %2, %3 : vector<16x128xi1>, vector<16x128xf32>
    %9 = arith.addf %0, %8 : vector<16x128xf32>
    %c126_i32 = arith.constant 126 : i32
    %10 = tpu.dynamic_rotate %9 by %c126_i32 dim 1 : vector<16x128xf32>, i32 -> vector<16x128xf32>
    %c2_i32 = arith.constant 2 : i32
    %11 = tpu.dynamic_rotate %9 by %c2_i32 dim 1 : vector<16x128xf32>, i32 -> vector<16x128xf32>
    %c2_i32_2 = arith.constant 2 : i32
    %12 = vector.broadcast %c2_i32_2 : i32 to vector<16x128xi32>
    %13 = arith.andi %1, %12 : vector<16x128xi32>
    %c0_i32_3 = arith.constant 0 : i32
    %14 = vector.broadcast %c0_i32_3 : i32 to vector<16x128xi32>
    %15 = arith.cmpi eq, %13, %14 : vector<16x128xi32>
    %16 = arith.select %15, %10, %11 : vector<16x128xi1>, vector<16x128xf32>
    %17 = arith.addf %9, %16 : vector<16x128xf32>
    %c124_i32 = arith.constant 124 : i32
    %18 = tpu.dynamic_rotate %17 by %c124_i32 dim 1 : vector<16x128xf32>, i32 -> vector<16x128xf32>
    %c4_i32 = arith.constant 4 : i32
    %19 = tpu.dynamic_rotate %17 by %c4_i32 dim 1 : vector<16x128xf32>, i32 -> vector<16x128xf32>
    %c4_i32_4 = arith.constant 4 : i32
    %20 = vector.broadcast %c4_i32_4 : i32 to vector<16x128xi32>
    %21 = arith.andi %1, %20 : vector<16x128xi32>
    %c0_i32_5 = arith.constant 0 : i32
    %22 = vector.broadcast %c0_i32_5 : i32 to vector<16x128xi32>
    %23 = arith.cmpi eq, %21, %22 : vector<16x128xi32>
    %24 = arith.select %23, %18, %19 : vector<16x128xi1>, vector<16x128xf32>
    %25 = arith.addf %17, %24 : vector<16x128xf32>
    %c120_i32 = arith.constant 120 : i32
    %26 = tpu.dynamic_rotate %25 by %c120_i32 dim 1 : vector<16x128xf32>, i32 -> vector<16x128xf32>
    %c8_i32 = arith.constant 8 : i32
    %27 = tpu.dynamic_rotate %25 by %c8_i32 dim 1 : vector<16x128xf32>, i32 -> vector<16x128xf32>
    %c8_i32_6 = arith.constant 8 : i32
    %28 = vector.broadcast %c8_i32_6 : i32 to vector<16x128xi32>
    %29 = arith.andi %1, %28 : vector<16x128xi32>
    %c0_i32_7 = arith.constant 0 : i32
    %30 = vector.broadcast %c0_i32_7 : i32 to vector<16x128xi32>
    %31 = arith.cmpi eq, %29, %30 : vector<16x128xi32>
    %32 = arith.select %31, %26, %27 : vector<16x128xi1>, vector<16x128xf32>
    %33 = arith.addf %25, %32 : vector<16x128xf32>
    %cst = arith.constant 6.250000e-02 : f32
    %34 = vector.broadcast %cst : f32 to vector<16x128xf32>
    %35 = arith.mulf %33, %34 : vector<16x128xf32>
    %36 = arith.subf %0, %35 : vector<16x128xf32>
    %c0_8 = arith.constant 0 : index
    %c0_9 = arith.constant 0 : index
    %37 = vector.load %arg2[%c0_8, %c0_9] : memref<16x128xf32, #tpu.memory_space<vmem>>, vector<16x128xf32>
    tpu.vector_store %arg2[%c0_8, %c0_9], %36 {strides = array<i32>} : memref<16x128xf32, #tpu.memory_space<vmem>>, vector<16x128xf32>,
    return
  }
  func.func @transform_0(%arg0: i32) -> (i32, i32) {
    %c0_i32 = arith.constant 0 : i32
    %c0_i32_0 = arith.constant 0 : i32
    return %arg0, %c0_i32 : i32, i32
  }
  func.func @transform_1(%arg0: i32) -> (i32, i32) {
    %c0_i32 = arith.constant 0 : i32
    %c0_i32_0 = arith.constant 0 : i32
    return %arg0, %c0_i32 : i32, i32
  }
}

</mosaic_0001>

<bundles_post_ra>
// kernel: mean_normalize.1
= control target key start
LH: loop header
LB: loop body
LE: loop exit
PB: predicated region body
PF: predicated region fallthrough
CT: control target
= control target key end

     0   :  { %s86_s8 = smov 1   ;;  %s87_s9 = smov 127   ;;  %v10_v2 = vlaneseq  ;;  %s128_s0 = inlined_call_operand.vmem [shape: f32[16,128], index: 0, kind: input, shape index: {}]   ;;  %s129_s1 = inlined_call_operand.vmem [shape: f32[16,128], index: 1, kind: output, shape index: {}]  }
   0x1   :  { %v107_v0 = vld [vmem:[%s128_s0] sm:$0xff]  ;;  %v114_v1 = vld [vmem:[%s128_s0 + $0x8] sm:$0xff]  ;;  %s88_s12 = smov 126   ;;  %s89_s0 = smov 2  }
   0x2   :  { %16 = vrot.lane.b32.xlu1 %v107_v0, %s86_s8  ;;  %12 = vrot.lane.b32.xlu0 %v107_v0, %s87_s9  ;;  %v11_v3 = vand.u32 127, %v10_v2  ;;  %s90_s13 = smov 124   ;;  %s91_s14 = smov 4  }
   0x3   :  { %s92_s15 = smov 120   ;;  %s93_s16 = smov 8  }
   0x4   :  { %v20_v4 = vand.u32 1, %v11_v3  ;;  %v34_v13 = vand.u32 2, %v11_v3  ;;  %v48_v22 = vand.u32 4, %v11_v3  ;;  %v62_v31 = vand.u32 8, %v11_v3 }
   0x6   :  { %18 = vrot.lane.b32.xlu1 %v114_v1, %s86_s8  ;;  %14 = vrot.lane.b32.xlu0 %v114_v1, %s87_s9  ;;  %vm21_vm0 = vcmp.eq.s32.totalorder %v20_v4, 0  ;;  %vm35_vm1 = vcmp.eq.s32.totalorder %v34_v13, 0  ;;  %vm49_vm2 = vcmp.eq.s32.totalorder %v48_v22, 0  ;;  %vm63_vm3 = vcmp.eq.s32.totalorder %v62_v31, 0 }
  0x74   :  { %v17_v5 = vpop.permute.xlu1 %16  ;;  %v13_v6 = vpop.permute.xlu0 %12 }
  0x75   :  { %v22_v7 = vsel %vm21_vm0, %v13_v6, %v17_v5 }
  0x76   :  { %v24_v8 = vadd.f32 %v22_v7, %v107_v0 }
  0x78   :  { %v19_v9 = vpop.permute.xlu1 %18  ;;  %26 = vrot.lane.b32.xlu0 %v24_v8, %s88_s12  ;;  %v15_v10 = vpop.permute.xlu0 %14 }
  0x79   :  { %v23_v11 = vsel %vm21_vm0, %v15_v10, %v19_v9 }
  0x7a   :  { %v25_v12 = vadd.f32 %v23_v11, %v114_v1 }
  0x7c   :  { %30 = vrot.lane.b32.xlu0 %v24_v8, %s89_s0  ;;  %28 = vrot.lane.b32.xlu1 %v25_v12, %s88_s12 }
  0x80   :  { %32 = vrot.lane.b32.xlu1 %v25_v12, %s89_s0 }
  0xea   :  { %v27_v14 = vpop.permute.xlu0 %26 }
  0xee   :  { %v29_v15 = vpop.permute.xlu1 %28  ;;  %v31_v16 = vpop.permute.xlu0 %30 }
  0xef   :  { %v36_v17 = vsel %vm35_vm1, %v27_v14, %v31_v16 }
  0xf0   :  { %v38_v18 = vadd.f32 %v36_v17, %v24_v8 }
  0xf2   :  { %v33_v19 = vpop.permute.xlu1 %32  ;;  %40 = vrot.lane.b32.xlu0 %v38_v18, %s90_s13 }
  0xf3   :  { %v37_v20 = vsel %vm35_vm1, %v29_v15, %v33_v19 }
  0xf4   :  { %v39_v21 = vadd.f32 %v37_v20, %v25_v12 }
  0xf6   :  { %42 = vrot.lane.b32.xlu1 %v39_v21, %s90_s13  ;;  %44 = vrot.lane.b32.xlu0 %v38_v18, %s91_s14 }
  0xfa   :  { %46 = vrot.lane.b32.xlu1 %v39_v21, %s91_s14 }
 0x164   :  { %v41_v23 = vpop.permute.xlu0 %40 }
 0x168   :  { %v43_v24 = vpop.permute.xlu1 %42  ;;  %v45_v25 = vpop.permute.xlu0 %44 }
 0x169   :  { %v50_v26 = vsel %vm49_vm2, %v41_v23, %v45_v25 }
 0x16a   :  { %v52_v27 = vadd.f32 %v50_v26, %v38_v18 }
 0x16c   :  { %v47_v28 = vpop.permute.xlu1 %46  ;;  %54 = vrot.lane.b32.xlu0 %v52_v27, %s92_s15 }
 0x16d   :  { %v51_v29 = vsel %vm49_vm2, %v43_v24, %v47_v28 }
 0x16e   :  { %v53_v30 = vadd.f32 %v51_v29, %v39_v21 }
 0x170   :  { %56 = vrot.lane.b32.xlu1 %v53_v30, %s92_s15  ;;  %58 = vrot.lane.b32.xlu0 %v52_v27, %s93_s16 }
 0x174   :  { %60 = vrot.lane.b32.xlu1 %v53_v30, %s93_s16 }
 0x1de   :  { %v55_v32 = vpop.permute.xlu0 %54 }
 0x1e2   :  { %v57_v33 = vpop.permute.xlu1 %56  ;;  %v59_v34 = vpop.permute.xlu0 %58 }
 0x1e3   :  { %v64_v35 = vsel %vm63_vm3, %v55_v32, %v59_v34 }
 0x1e4   :  { %v66_v36 = vadd.f32 %v64_v35, %v52_v27 }
 0x1e6   :  { %v68_v37 = vmul.f32 0.0625, %v66_v36  ;;  %v61_v38 = vpop.permute.xlu1 %60 }
 0x1e7   :  { %v65_v39 = vsel %vm63_vm3, %v57_v33, %v61_v38 }
 0x1e8   :  { %v70_v40 = vsub.f32 %v107_v0, %v68_v37  ;;  %v67_v41 = vadd.f32 %v65_v39, %v53_v30 }
 0x1ea   :  { %72 = vst [vmem:[%s129_s1] sm:$0xff] %v70_v40  ;;  %v69_v42 = vmul.f32 0.0625, %v67_v41 }
 0x1ec   :  { %v71_v43 = vsub.f32 %v114_v1, %v69_v42 }
 0x1ee   :  { %73 = vst [vmem:[%s129_s1 + $0x8] sm:$0xff] %v71_v43 }

</bundles_post_ra>
